<compile_context>
chip_gen: v7x
topology: tpu7x:2x2x1
jax: 0.10.0
libtpu: 0.0.40
codegen_flags: <defaults>
</compile_context>

<pallas_src>
import functools

import jax
import jax.numpy as jnp
from jax.experimental import pallas as pl
from jax.experimental.pallas import tpu as pltpu

LANE = 128
SUBLANE = 8


def _round_up(n, m):
    return ((n + m - 1) // m) * m


def _pick_batch_tiling(batch, tile_cap=512, min_tiles=2):
    """Pick (tile_b, batch_padded, n_tiles).

    * tiles are <= tile_cap rows (amortizes ~0.35us/step while bounding VMEM),
    * >= min_tiles tiles whenever there is enough work, so v7x's two TensorCores
      both get batch tiles (no-op on v5e/v6e),
    * batch is padded only to a sublane-rounded tile size (waste < tile_b rows).
    """
    n_tiles = max(pl.cdiv(batch, tile_cap), 1)
    if batch > 2 * SUBLANE:
        n_tiles = max(n_tiles, min_tiles)
    tile_b = _round_up(pl.cdiv(batch, n_tiles), SUBLANE)
    n_tiles = pl.cdiv(batch, tile_b)
    return tile_b, n_tiles * tile_b, n_tiles


def feedforward_kernel(x_ref, w1_ref, b1_ref, w2_ref, b2_ref, w3_ref, b3_ref,
                       o_ref, *, out_valid):
    # Streamed x tile: cast to bf16 for the MXU (weights are already bf16);
    # accumulate in f32.  Padded weight rows/cols are zero, so padding stays inert.
    x = x_ref[...].astype(jnp.bfloat16)

    # fc1 + ReLU (bias add / ReLU in f32)
    h1 = jnp.dot(x, w1_ref[...], preferred_element_type=jnp.float32) + b1_ref[...]
    h1 = jnp.maximum(h1, 0.0)

    # fc2 + ReLU
    h2 = jnp.dot(h1.astype(jnp.bfloat16), w2_ref[...],
                 preferred_element_type=jnp.float32) + b2_ref[...]
    h2 = jnp.maximum(h2, 0.0)

    # fc3
    h3 = jnp.dot(h2.astype(jnp.bfloat16), w3_ref[...],
                 preferred_element_type=jnp.float32) + b3_ref[...]

    # softmax over dim=1; mask padded lanes only when padding exists (static decision).
    if out_valid is not None:
        lane_idx = jax.lax.broadcasted_iota(jnp.int32, h3.shape, dimension=1)
        h3 = jnp.where(lane_idx < out_valid, h3, -1e30)

    m = jnp.max(h3, axis=-1, keepdims=True)
    e = jnp.exp(h3 - m)
    denom = jnp.sum(e, axis=-1, keepdims=True)
    o_ref[...] = (e * pl.reciprocal(denom, approx=True)).astype(o_ref.dtype)


def prepare_params(w1, b1, w2, b2, w3, b3):
    """One-time: lane-pad every feature dim to a multiple of 128 and cast weights to bf16."""
    in_f, hid = w1.shape
    out_f = w3.shape[1]
    in_p = _round_up(in_f, LANE)
    hid_p = _round_up(hid, LANE)
    out_p = _round_up(out_f, LANE)

    bf16 = jnp.bfloat16
    return dict(
        w1=jnp.pad(w1, ((0, in_p - in_f), (0, hid_p - hid))).astype(bf16),
        w2=jnp.pad(w2, ((0, hid_p - hid), (0, hid_p - hid))).astype(bf16),
        w3=jnp.pad(w3, ((0, hid_p - hid), (0, out_p - out_f))).astype(bf16),
        b1=jnp.pad(b1.reshape(1, -1), ((0, 0), (0, hid_p - hid))).astype(jnp.float32),
        b2=jnp.pad(b2.reshape(1, -1), ((0, 0), (0, hid_p - hid))).astype(jnp.float32),
        b3=jnp.pad(b3.reshape(1, -1), ((0, 0), (0, out_p - out_f))).astype(jnp.float32),
        in_f=in_f, out_f=out_f, in_p=in_p, hid_p=hid_p, out_p=out_p,
    )


def feedforward(x, params, *, tile_cap=512):
    batch, in_f = x.shape
    assert in_f == params["in_f"]
    in_p, hid_p, out_p = params["in_p"], params["hid_p"], params["out_p"]
    out_f = params["out_f"]

    tile_b, batch_p, n_tiles = _pick_batch_tiling(batch, tile_cap)

    xp = x
    if (batch_p, in_p) != (batch, in_f):
        xp = jnp.pad(x, ((0, batch_p - batch), (0, in_p - in_f)))

    # VMEM budget: single-buffered bf16 weights + f32 biases, double-buffered x/out
    # tiles, plus f32 activation intermediates (h1/h2 + softmax temps).
    resident_bytes = 2 * (in_p * hid_p + hid_p * hid_p + hid_p * out_p)   # bf16 weights
    resident_bytes += 4 * (2 * hid_p + out_p)                             # f32 biases
    stream_bytes = 2 * tile_b * in_p * 4 + 2 * tile_b * out_p * 4         # x / out, 2 bufs
    scratch_bytes = 2 * tile_b * hid_p * 4 + 2 * tile_b * out_p * 4       # h1, h2, exp/temps
    vmem_limit = max(int((resident_bytes + stream_bytes + scratch_bytes) * 1.25)
                     + (4 << 20), 32 << 20)

    # Resident weights/biases: constant index_map keeps them in VMEM across all grid
    # steps; Buffered(1) drops the never-used second pipeline buffer.
    def resident(shape):
        return pl.BlockSpec(shape, lambda i: (0, 0), pipeline_mode=pl.Buffered(1))

    mask_lanes = out_f if out_f != out_p else None

    out_padded = pl.pallas_call(
        functools.partial(feedforward_kernel, out_valid=mask_lanes),
        out_shape=jax.ShapeDtypeStruct((batch_p, out_p), jnp.float32),
        grid=(n_tiles,),
        in_specs=[
            pl.BlockSpec((tile_b, in_p), lambda i: (i, 0)),   # x: streamed over batch
            resident((in_p, hid_p)), resident((1, hid_p)),     # fc1
            resident((hid_p, hid_p)), resident((1, hid_p)),    # fc2
            resident((hid_p, out_p)), resident((1, out_p)),    # fc3
        ],
        out_specs=pl.BlockSpec((tile_b, out_p), lambda i: (i, 0)),
        compiler_params=pltpu.CompilerParams(
            dimension_semantics=("parallel",),   # v7x: 2 TCs split the batch tiles
            vmem_limit_bytes=vmem_limit),
    )(xp, params["w1"], params["b1"], params["w2"], params["b2"],
      params["w3"], params["b3"])

    return out_padded[:batch, :out_f]


def init_linear(key, fan_in, fan_out):
    # Deterministic init mimicking torch.nn.Linear (uniform +/- 1/sqrt(fan_in)).
    kw, kb = jax.random.split(key)
    bound = 1.0 / (fan_in ** 0.5)
    w = jax.random.uniform(kw, (fan_in, fan_out), jnp.float32, -bound, bound)
    b = jax.random.uniform(kb, (fan_out,), jnp.float32, -bound, bound)
    return w, b


def _reference(x, w1, b1, w2, b2, w3, b3):
    # Same dtype strategy as the kernel: bf16 dot operands, f32 accumulation/elementwise.
    bf16 = jnp.bfloat16
    h = jnp.maximum(jnp.dot(x.astype(bf16), w1.astype(bf16),
                            preferred_element_type=jnp.float32) + b1, 0.0)
    h = jnp.maximum(jnp.dot(h.astype(bf16), w2.astype(bf16),
                            preferred_element_type=jnp.float32) + b2, 0.0)
    logits = jnp.dot(h.astype(bf16), w3.astype(bf16),
                     preferred_element_type=jnp.float32) + b3
    return jax.nn.softmax(logits, axis=1)


if __name__ == "__main__":
    # Module config: input_size=16, hidden_size=32 (out_size and fc4/fc5/fc6/sigmoid are
    # unused by forward(), so they are not built).  forward() output width = hidden_size.
    input_size, hidden_size = 16, 32
    batch = 8

    key = jax.random.PRNGKey(0)
    kx, k1, k2, k3 = jax.random.split(key, 4)

    x = jax.random.normal(kx, (batch, input_size), jnp.float32)
    w1, b1 = init_linear(k1, input_size, hidden_size)
    w2, b2 = init_linear(k2, hidden_size, hidden_size)
    w3, b3 = init_linear(k3, hidden_size, hidden_size)

    params = prepare_params(w1, b1, w2, b2, w3, b3)   # pad + bf16-cast weights ONCE

    out = feedforward(x, params)
    out = jax.block_until_ready(out)

    ref = _reference(x, w1, b1, w2, b2, w3, b3)
    assert out.shape == (batch, hidden_size)
    # Tolerance covers the approx reciprocal (~1e-3) and any accumulation-order delta.
    assert jnp.allclose(out, ref, atol=5e-3, rtol=5e-3), "mismatch vs reference"

    print("KERNEL_OK")
</pallas_src>

<mosaic_0001>
module attributes {stable_mosaic.version = 11 : i64} {
  func.func @feedforward_kernel(%arg0: i32, %arg1: memref<8x128xf32, #tpu.memory_space<vmem>>, %arg2: memref<128x128xbf16, #tpu.memory_space<vmem>>, %arg3: memref<1x128xf32, #tpu.memory_space<vmem>>, %arg4: memref<128x128xbf16, #tpu.memory_space<vmem>>, %arg5: memref<1x128xf32, #tpu.memory_space<vmem>>, %arg6: memref<128x128xbf16, #tpu.memory_space<vmem>>, %arg7: memref<1x128xf32, #tpu.memory_space<vmem>>, %arg8: memref<8x128xf32, #tpu.memory_space<vmem>>) attributes {dimension_semantics = [#tpu.dimension_semantics<parallel>], iteration_bounds = array<i64: 1>, scalar_prefetch = 0 : i64, scratch_operands = 0 : i64, tpu.core_type = #tpu.core_type<tc>, window_params = [{transform_indices = @transform_0, window_bounds = array<i64: 8, 128>}, {pipeline_mode = #tpu.pipeline_mode<synchronous>, transform_indices = @transform_1, window_bounds = array<i64: 128, 128>}, {pipeline_mode = #tpu.pipeline_mode<synchronous>, transform_indices = @transform_2, window_bounds = array<i64: 1, 128>}, {pipeline_mode = #tpu.pipeline_mode<synchronous>, transform_indices = @transform_3, window_bounds = array<i64: 128, 128>}, {pipeline_mode = #tpu.pipeline_mode<synchronous>, transform_indices = @transform_4, window_bounds = array<i64: 1, 128>}, {pipeline_mode = #tpu.pipeline_mode<synchronous>, transform_indices = @transform_5, window_bounds = array<i64: 128, 128>}, {pipeline_mode = #tpu.pipeline_mode<synchronous>, transform_indices = @transform_6, window_bounds = array<i64: 1, 128>}, {transform_indices = @transform_7, window_bounds = array<i64: 8, 128>}]} {
    %c0 = arith.constant 0 : index
    %c0_0 = arith.constant 0 : index
    %0 = vector.load %arg1[%c0, %c0_0] : memref<8x128xf32, #tpu.memory_space<vmem>>, vector<8x128xf32>
    %1 = arith.truncf %0 : vector<8x128xf32> to vector<8x128xbf16>
    %c0_1 = arith.constant 0 : index
    %c0_2 = arith.constant 0 : index
    %2 = vector.load %arg2[%c0_1, %c0_2] : memref<128x128xbf16, #tpu.memory_space<vmem>>, vector<128x128xbf16>
    %cst = arith.constant dense<0.000000e+00> : vector<8x128xf32>
    %3 = tpu.matmul %1, %2, %cst {dimension_numbers = #tpu.dot_dimension_numbers<[1], [0], [0], [1], [0, 0, 1, 1], [], []>} : vector<8x128xbf16>, vector<128x128xbf16>, vector<8x128xf32> -> vector<8x128xf32>
    %c0_3 = arith.constant 0 : index
    %c0_4 = arith.constant 0 : index
    %4 = vector.load %arg3[%c0_3, %c0_4] : memref<1x128xf32, #tpu.memory_space<vmem>>, vector<1x128xf32>
    %5 = vector.broadcast %4 : vector<1x128xf32> to vector<8x128xf32>
    %6 = arith.addf %3, %5 : vector<8x128xf32>
    %cst_5 = arith.constant 0.000000e+00 : f32
    %7 = vector.broadcast %cst_5 : f32 to vector<8x128xf32>
    %8 = arith.maximumf %6, %7 : vector<8x128xf32>
    %9 = arith.truncf %8 : vector<8x128xf32> to vector<8x128xbf16>
    %c0_6 = arith.constant 0 : index
    %c0_7 = arith.constant 0 : index
    %10 = vector.load %arg4[%c0_6, %c0_7] : memref<128x128xbf16, #tpu.memory_space<vmem>>, vector<128x128xbf16>
    %cst_8 = arith.constant dense<0.000000e+00> : vector<8x128xf32>
    %11 = tpu.matmul %9, %10, %cst_8 {dimension_numbers = #tpu.dot_dimension_numbers<[1], [0], [0], [1], [0, 0, 1, 1], [], []>} : vector<8x128xbf16>, vector<128x128xbf16>, vector<8x128xf32> -> vector<8x128xf32>
    %c0_9 = arith.constant 0 : index
    %c0_10 = arith.constant 0 : index
    %12 = vector.load %arg5[%c0_9, %c0_10] : memref<1x128xf32, #tpu.memory_space<vmem>>, vector<1x128xf32>
    %13 = vector.broadcast %12 : vector<1x128xf32> to vector<8x128xf32>
    %14 = arith.addf %11, %13 : vector<8x128xf32>
    %cst_11 = arith.constant 0.000000e+00 : f32
    %15 = vector.broadcast %cst_11 : f32 to vector<8x128xf32>
    %16 = arith.maximumf %14, %15 : vector<8x128xf32>
    %17 = arith.truncf %16 : vector<8x128xf32> to vector<8x128xbf16>
    %c0_12 = arith.constant 0 : index
    %c0_13 = arith.constant 0 : index
    %18 = vector.load %arg6[%c0_12, %c0_13] : memref<128x128xbf16, #tpu.memory_space<vmem>>, vector<128x128xbf16>
    %cst_14 = arith.constant dense<0.000000e+00> : vector<8x128xf32>
    %19 = tpu.matmul %17, %18, %cst_14 {dimension_numbers = #tpu.dot_dimension_numbers<[1], [0], [0], [1], [0, 0, 1, 1], [], []>} : vector<8x128xbf16>, vector<128x128xbf16>, vector<8x128xf32> -> vector<8x128xf32>
    %c0_15 = arith.constant 0 : index
    %c0_16 = arith.constant 0 : index
    %20 = vector.load %arg7[%c0_15, %c0_16] : memref<1x128xf32, #tpu.memory_space<vmem>>, vector<1x128xf32>
    %21 = vector.broadcast %20 : vector<1x128xf32> to vector<8x128xf32>
    %22 = arith.addf %19, %21 : vector<8x128xf32>
    %23 = tpu.iota {dimensions = array<i32: 1>} : vector<8x128xi32>
    %c32_i32 = arith.constant 32 : i32
    %24 = vector.broadcast %c32_i32 : i32 to vector<8x128xi32>
    %25 = arith.cmpi slt, %23, %24 : vector<8x128xi32>
    %cst_17 = arith.constant -1.000000e+30 : f32
    %26 = vector.broadcast %cst_17 : f32 to vector<8x128xf32>
    %27 = arith.select %25, %22, %26 : vector<8x128xi1>, vector<8x128xf32>
    %cst_18 = arith.constant dense<0xFF800000> : vector<8xf32>
    %28 = vector.multi_reduction <maximumf>, %27, %cst_18 [1] : vector<8x128xf32> to vector<8xf32>
    %29 = vector.shape_cast %28 : vector<8xf32> to vector<8x1xf32>
    %30 = vector.broadcast %29 : vector<8x1xf32> to vector<8x128xf32>
    %31 = arith.subf %27, %30 : vector<8x128xf32>
    %32 = math.exp %31 : vector<8x128xf32>
    %cst_19 = arith.constant dense<0.000000e+00> : vector<8xf32>
    %33 = vector.multi_reduction <add>, %32, %cst_19 [1] : vector<8x128xf32> to vector<8xf32>
    %34 = vector.shape_cast %33 : vector<8xf32> to vector<8x1xf32>
    %35 = tpu.reciprocal %34 {approx = true} : vector<8x1xf32> -> vector<8x1xf32>
    %36 = vector.broadcast %35 : vector<8x1xf32> to vector<8x128xf32>
    %37 = arith.mulf %32, %36 : vector<8x128xf32>
    %c0_20 = arith.constant 0 : index
    %c0_21 = arith.constant 0 : index
    %38 = vector.load %arg8[%c0_20, %c0_21] : memref<8x128xf32, #tpu.memory_space<vmem>>, vector<8x128xf32>
    tpu.vector_store %arg8[%c0_20, %c0_21], %37 {strides = array<i32>} : memref<8x128xf32, #tpu.memory_space<vmem>>, vector<8x128xf32>,
    return
  }
  func.func @transform_0(%arg0: i32) -> (i32, i32) {
    %c0_i32 = arith.constant 0 : i32
    %c0_i32_0 = arith.constant 0 : i32
    return %arg0, %c0_i32 : i32, i32
  }
  func.func @transform_1(%arg0: i32) -> (i32, i32) {
    %c0_i32 = arith.constant 0 : i32
    %c0_i32_0 = arith.constant 0 : i32
    %c0_i32_1 = arith.constant 0 : i32
    return %c0_i32, %c0_i32_0 : i32, i32
  }
  func.func @transform_2(%arg0: i32) -> (i32, i32) {
    %c0_i32 = arith.constant 0 : i32
    %c0_i32_0 = arith.constant 0 : i32
    %c0_i32_1 = arith.constant 0 : i32
    return %c0_i32, %c0_i32_0 : i32, i32
  }
  func.func @transform_3(%arg0: i32) -> (i32, i32) {
    %c0_i32 = arith.constant 0 : i32
    %c0_i32_0 = arith.constant 0 : i32
    %c0_i32_1 = arith.constant 0 : i32
    return %c0_i32, %c0_i32_0 : i32, i32
  }
  func.func @transform_4(%arg0: i32) -> (i32, i32) {
    %c0_i32 = arith.constant 0 : i32
    %c0_i32_0 = arith.constant 0 : i32
    %c0_i32_1 = arith.constant 0 : i32
    return %c0_i32, %c0_i32_0 : i32, i32
  }
  func.func @transform_5(%arg0: i32) -> (i32, i32) {
    %c0_i32 = arith.constant 0 : i32
    %c0_i32_0 = arith.constant 0 : i32
    %c0_i32_1 = arith.constant 0 : i32
    return %c0_i32, %c0_i32_0 : i32, i32
  }
  func.func @transform_6(%arg0: i32) -> (i32, i32) {
    %c0_i32 = arith.constant 0 : i32
    %c0_i32_0 = arith.constant 0 : i32
    %c0_i32_1 = arith.constant 0 : i32
    return %c0_i32, %c0_i32_0 : i32, i32
  }
  func.func @transform_7(%arg0: i32) -> (i32, i32) {
    %c0_i32 = arith.constant 0 : i32
    %c0_i32_0 = arith.constant 0 : i32
    return %arg0, %c0_i32 : i32, i32
  }
}

</mosaic_0001>

<bundles_post_ra>
// kernel: tpu_custom_call.1
= control target key start
LH: loop header
LB: loop body
LE: loop exit
PB: predicated region body
PF: predicated region fallthrough
CT: control target
= control target key end

     0   :  { %12 = vsyncpa [#allocation3], 0  ;;  %s877_s0 = inlined_call_operand.hbm [shape: f32[8,128], index: 0, kind: input, shape index: {}]   ;;  %s878_s1 = inlined_call_operand.hbm [shape: bf16[128,128], index: 1, kind: input, shape index: {}]   ;;  %s879_s2 = inlined_call_operand.vmem [shape: f32[1,128], index: 2, kind: input, shape index: {}]   ;;  %s880_s3 = inlined_call_operand.hbm [shape: bf16[128,128], index: 3, kind: input, shape index: {}]   ;;  %s881_s4 = inlined_call_operand.vmem [shape: f32[1,128], index: 4, kind: input, shape index: {}]   ;;  %s882_s5 = inlined_call_operand.hbm [shape: bf16[128,128], index: 5, kind: input, shape index: {}]   ;;  %s883_s6 = inlined_call_operand.vmem [shape: f32[1,128], index: 6, kind: input, shape index: {}]   ;;  %s884_s7 = inlined_call_operand.hbm [shape: f32[8,128], index: 7, kind: output, shape index: {}]  }
   0x1   :  { %13 = vsyncpa [#allocation6], 0 }
   0x2   :  { %14 = vsyncpa [#allocation9], 0 }
   0x3   :  { %15 = vsyncpa [#allocation4], 0  ;;  %s720_s24 = smov [#allocation5]   ;;  %s602_s28 = scalar_lea.hbm %s878_s1, 1024 }
   0x4   :  { %s31_s25 = sshll.u32 %s720_s24, 4  ;;  %p603_p0 = scmp.ne.s32.totalorder %s878_s1, %s602_s28  ;;  %s32_s25 = int_to_ptr.vmem [resolvable:$true] %s31_s25 }
   0x5   :  { %p606_p1 = scmp.lt.u32.totalorder %s602_s28, %s878_s1 }
   0x7   :  { %p608_p2 = pnand %p606_p1, %p603_p0 }
   0x9   :  { %611 = shalt.err (!%p608_p2)
}
   0xa   :  { %s612_s10 = scalar_lea.vmem %s32_s25, 1024  ;;  %p617_p4 = scmp.lt.s32.totalorder %s32_s25, %s32_s25 }
   0xb   :  { %p613_p3 = scmp.ne.s32.totalorder %s32_s25, %s612_s10  ;;  %p618_p5 = scmp.lt.s32.totalorder %s612_s10, %s612_s10 }
   0xd   :  { %p619_p6 = por %p618_p5, %p617_p4 }
   0xf   :  { %p620_p7 = pnand %p619_p6, %p613_p3 }
  0x11   :  { %623 = shalt.err (!%p620_p7)
}
  0x12   :  { %s721_s11 = smov 64   ;;  %s722_s12 = smov 4  }
  0x13   :  { %37 = dma.hbm_to_vmem [thread:$0]  %s878_s1, 1024, %s32_s25, [#allocation6], %s721_s11, %s721_s11, %s722_s12  }
  0x14   :  { %s723_s15 = smov [#allocation2]   ;;  %s724_s17 = smov [#allocation7]  }
  0x15   :  { %s22_s16 = sshll.u32 %s723_s15, 4  ;;  %s45_s18 = sshll.u32 %s724_s17, 4  ;;  %s23_s16 = int_to_ptr.vmem [resolvable:$true] %s22_s16  ;;  %s46_s18 = int_to_ptr.vmem [resolvable:$true] %s45_s18 }
  0x16   :  { %s624_s21 = scalar_lea.hbm %s877_s0, 128 }
  0x17   :  { %p625_p8 = scmp.ne.s32.totalorder %s877_s0, %s624_s21  ;;  %p628_p9 = scmp.lt.u32.totalorder %s624_s21, %s877_s0 }
  0x19   :  { %p630_p10 = pnand %p628_p9, %p625_p8 }
  0x1b   :  { %633 = shalt.err (!%p630_p10)
}
  0x1c   :  { %s634_s1 = scalar_lea.vmem %s23_s16, 128  ;;  %p639_p12 = scmp.lt.s32.totalorder %s23_s16, %s23_s16 }
  0x1d   :  { %p635_p11 = scmp.ne.s32.totalorder %s23_s16, %s634_s1  ;;  %p640_p13 = scmp.lt.s32.totalorder %s634_s1, %s634_s1 }
  0x1f   :  { %p641_p0 = por %p640_p13, %p639_p12 }
  0x21   :  { %p642_p1 = pnand %p641_p0, %p635_p11 }
  0x23   :  { %645 = shalt.err (!%p642_p1)
}
  0x24   :  { %25 = dma.hbm_to_vmem [thread:$0]  %s877_s0, 128, %s23_s16, [#allocation3]  }
  0x25   :  { %s646_s30 = scalar_lea.hbm %s880_s3, 1024 }
  0x26   :  { %p647_p2 = scmp.ne.s32.totalorder %s880_s3, %s646_s30  ;;  %p650_p3 = scmp.lt.u32.totalorder %s646_s30, %s880_s3 }
  0x28   :  { %p652_p4 = pnand %p650_p3, %p647_p2 }
  0x2a   :  { %655 = shalt.err (!%p652_p4)
}
  0x2b   :  { %s656_s14 = scalar_lea.vmem %s46_s18, 1024  ;;  %p661_p6 = scmp.lt.s32.totalorder %s46_s18, %s46_s18 }
  0x2c   :  { %p657_p5 = scmp.ne.s32.totalorder %s46_s18, %s656_s14  ;;  %p662_p7 = scmp.lt.s32.totalorder %s656_s14, %s656_s14 }
  0x2e   :  { %p663_p8 = por %p662_p7, %p661_p6 }
  0x30   :  { %p664_p9 = pnand %p663_p8, %p657_p5 }
  0x32   :  { %667 = shalt.err (!%p664_p9)
}
  0x33   :  { %51 = dma.hbm_to_vmem [thread:$0]  %s880_s3, 1024, %s46_s18, [#allocation6], %s721_s11, %s721_s11, %s722_s12  }
  0x34   :  { %s725_s16 = smov [#allocation8]   ;;  %s668_s21 = scalar_lea.hbm %s882_s5, 1024 }
  0x35   :  { %s59_s17 = sshll.u32 %s725_s16, 4  ;;  %p669_p10 = scmp.ne.s32.totalorder %s882_s5, %s668_s21  ;;  %s60_s17 = int_to_ptr.vmem [resolvable:$true] %s59_s17 }
  0x36   :  { %p672_p11 = scmp.lt.u32.totalorder %s668_s21, %s882_s5 }
  0x38   :  { %p674_p12 = pnand %p672_p11, %p669_p10 }
  0x3a   :  { %677 = shalt.err (!%p674_p12)
}
  0x3b   :  { %s678_s1 = scalar_lea.vmem %s60_s17, 1024  ;;  %p683_p0 = scmp.lt.s32.totalorder %s60_s17, %s60_s17 }
  0x3c   :  { %p679_p13 = scmp.ne.s32.totalorder %s60_s17, %s678_s1  ;;  %p684_p1 = scmp.lt.s32.totalorder %s678_s1, %s678_s1 }
  0x3e   :  { %p685_p2 = por %p684_p1, %p683_p0 }
  0x40   :  { %p686_p3 = pnand %p685_p2, %p679_p13 }
  0x42   :  { %689 = shalt.err (!%p686_p3)
}
  0x43   :  { %65 = dma.hbm_to_vmem [thread:$0]  %s882_s5, 1024, %s60_s17, [#allocation9], %s721_s11, %s721_s11, %s722_s12  }
  0x44   :  { %712 = dma.done.wait [#allocation3], 128  }
  0x45   :  { %713 = vsyncadd [#allocation3], 4294967168 }
  0x46   :  { %714 = dma.done.wait [#allocation6], 2048  }
  0x47   :  { %715 = vsyncadd [#allocation6], 4294965248 }
  0x48   :  { %716 = dma.done.wait [#allocation9], 1024  }
  0x49   :  { %717 = vsyncadd [#allocation9], 4294966272  ;;  %v726_v0 = vmov 0.0   ;;  %vm727_vm0 = vmmov 0   ;;  %v574_v1 = vld [vmem:[#allocation5] sm:$0xff]   ;;  %v575_v2 = vld [vmem:[#allocation5 + $0x8] sm:$0xff]   ;;  %v420_v43 = vlaneseq }
  0x4a   :  { %505 = vmatprep.subr.bf16.mxu0 %v726_v0  ;;  %521 = vmatprep.mubr.msk.bf16.mxu0 %vm727_vm0, %v726_v0  ;;  %v576_v3 = vld [vmem:[#allocation5 + $0x10] sm:$0xff]   ;;  %v582_v4 = vld [vmem:[#allocation7] sm:$0xff]   ;;  %v577_v5 = vld [vmem:[#allocation5 + $0x18] sm:$0xff]  }
  0x4b   :  { %525 = vmatprep.subr.bf16.mxu1 %v726_v0  ;;  %541 = vmatprep.mubr.msk.bf16.mxu1 %vm727_vm0, %v726_v0  ;;  %v583_v6 = vld [vmem:[#allocation7 + $0x8] sm:$0xff]   ;;  %v578_v7 = vld [vmem:[#allocation5 + $0x20] sm:$0xff]   ;;  %v584_v8 = vld [vmem:[#allocation7 + $0x10] sm:$0xff]   ;;  %v421_v44 = vand.u32 127, %v420_v43 }
  0x4c   :  { %506 = vmatpush3.bf16.msra.mxu0 %v574_v1  ;;  %526 = vmatpush3.bf16.msra.mxu1 %v582_v4  ;;  %v579_v9 = vld [vmem:[#allocation5 + $0x28] sm:$0xff]   ;;  %v585_v10 = vld [vmem:[#allocation7 + $0x18] sm:$0xff]   ;;  %v580_v11 = vld [vmem:[#allocation5 + $0x30] sm:$0xff]  }
  0x4d   :  { %507 = vmatprep.subr.bf16.mxu0 %v726_v0  ;;  %527 = vmatprep.subr.bf16.mxu1 %v726_v0  ;;  %v586_v12 = vld [vmem:[#allocation7 + $0x20] sm:$0xff]   ;;  %v581_v13 = vld [vmem:[#allocation5 + $0x38] sm:$0xff]   ;;  %v587_v15 = vld [vmem:[#allocation7 + $0x28] sm:$0xff]   ;;  %vm422_vm1 = vcmp.lt.s32.totalorder %v421_v44, 32 }
  0x4e   :  { %v81_v14 = vld [vmem:[#allocation2] sm:$0xff]  ;;  %v588_v17 = vld [vmem:[#allocation7 + $0x30] sm:$0xff]   ;;  %v590_v19 = vld [vmem:[#allocation8] sm:$0xff]  }
  0x4f   :  { %v82_v16 = vpack.c.bf16 %v81_v14, %v81_v14  ;;  %v589_v18 = vld [vmem:[#allocation7 + $0x38] sm:$0xff]   ;;  %v591_v20 = vld [vmem:[#allocation8 + $0x8] sm:$0xff]   ;;  %v592_v21 = vld [vmem:[#allocation8 + $0x10] sm:$0xff]  }
  0x50   :  { %508 = vmatpush3.bf16.msra.mxu0 %v575_v2  ;;  %528 = vmatpush3.bf16.msra.mxu1 %v583_v6  ;;  %v593_v22 = vld [vmem:[#allocation8 + $0x18] sm:$0xff]   ;;  %v594_v23 = vld [vmem:[#allocation8 + $0x20] sm:$0xff]   ;;  %v595_v24 = vld [vmem:[#allocation8 + $0x28] sm:$0xff]  }
  0x51   :  { %509 = vmatprep.subr.bf16.mxu0 %v726_v0  ;;  %529 = vmatprep.subr.bf16.mxu1 %v726_v0  ;;  %v451_v25 = vld [vmem:[%s879_s2] ss:$0 sm:$0xff]  ;;  %v596_v33 = vld [vmem:[#allocation8 + $0x30] sm:$0xff]  }
  0x52   :  { %v597_v34 = vld [vmem:[#allocation8 + $0x38] sm:$0xff]  }
  0x53   :  { %v460_v35 = vld [vmem:[%s881_s4] ss:$0 sm:$0xff]  ;;  %s728_s4 = smov [#allocation10]  }
  0x54   :  { %510 = vmatpush3.bf16.msra.mxu0 %v576_v3  ;;  %530 = vmatpush3.bf16.msra.mxu1 %v584_v8  ;;  %v469_v45 = vld [vmem:[%s883_s6] ss:$0 sm:$0xff]  ;;  %s440_s28 = sshll.u32 %s728_s4, 4  ;;  %s441_s28 = int_to_ptr.vmem [resolvable:$true] %s440_s28 }
  0x55   :  { %511 = vmatprep.subr.bf16.mxu0 %v726_v0  ;;  %531 = vmatprep.subr.bf16.mxu1 %v726_v0  ;;  %s690_s6 = scalar_lea.vmem %s441_s28, 128  ;;  %p695_p5 = scmp.lt.s32.totalorder %s441_s28, %s441_s28 }
  0x56   :  { %p691_p4 = scmp.ne.s32.totalorder %s441_s28, %s690_s6  ;;  %p696_p6 = scmp.lt.s32.totalorder %s690_s6, %s690_s6 }
  0x58   :  { %512 = vmatpush3.bf16.msra.mxu0 %v577_v5  ;;  %532 = vmatpush3.bf16.msra.mxu1 %v585_v10  ;;  %p697_p7 = por %p696_p6, %p695_p5 }
  0x59   :  { %513 = vmatprep.subr.bf16.mxu0 %v726_v0  ;;  %533 = vmatprep.subr.bf16.mxu1 %v726_v0 }
  0x5a   :  { %p698_p8 = pnand %p697_p7, %p691_p4 }
  0x5c   :  { %514 = vmatpush3.bf16.msra.mxu0 %v578_v7  ;;  %534 = vmatpush3.bf16.msra.mxu1 %v586_v12 }
  0x5d   :  { %515 = vmatprep.subr.bf16.mxu0 %v726_v0  ;;  %535 = vmatprep.subr.bf16.mxu1 %v726_v0 }
  0x60   :  { %516 = vmatpush3.bf16.msra.mxu0 %v579_v9  ;;  %536 = vmatpush3.bf16.msra.mxu1 %v587_v15 }
  0x61   :  { %517 = vmatprep.subr.bf16.mxu0 %v726_v0  ;;  %537 = vmatprep.subr.bf16.mxu1 %v726_v0 }
  0x64   :  { %518 = vmatpush3.bf16.msra.mxu0 %v580_v11  ;;  %538 = vmatpush3.bf16.msra.mxu1 %v588_v17 }
  0x65   :  { %519 = vmatprep.subr.bf16.mxu0 %v726_v0  ;;  %539 = vmatprep.subr.bf16.mxu1 %v726_v0 }
  0x68   :  { %520 = vmatpush3.bf16.msra.mxu0 %v581_v13  ;;  %540 = vmatpush3.bf16.msra.mxu1 %v589_v18 }
  0x69   :  { %545 = vmatprep.subr.bf16.mxu0 %v726_v0 }
  0x6b   :  { %522 = vmatmul.mubr.bf16.vlgmr.msra.gmra.mrb[0].mxu0 %v82_v16 }
  0x6c   :  { %561 = vmatprep.mubr.msk.bf16.mxu0 %vm727_vm0, %v726_v0  ;;  %546 = vmatpush3.bf16.msra.mxu0 %v590_v19 }
  0x6d   :  { %547 = vmatprep.subr.bf16.mxu0 %v726_v0 }
  0x70   :  { %548 = vmatpush3.bf16.msra.mxu0 %v591_v20 }
  0x71   :  { %549 = vmatprep.subr.bf16.mxu0 %v726_v0 }
  0x74   :  { %550 = vmatpush3.bf16.msra.mxu0 %v592_v21 }
  0x75   :  { %551 = vmatprep.subr.bf16.mxu0 %v726_v0 }
  0x78   :  { %552 = vmatpush3.bf16.msra.mxu0 %v593_v22 }
  0x79   :  { %553 = vmatprep.subr.bf16.mxu0 %v726_v0 }
  0x7c   :  { %554 = vmatpush3.bf16.msra.mxu0 %v594_v23 }
  0x7d   :  { %555 = vmatprep.subr.bf16.mxu0 %v726_v0 }
  0x80   :  { %556 = vmatpush3.bf16.msra.mxu0 %v595_v24 }
  0x81   :  { %557 = vmatprep.subr.bf16.mxu0 %v726_v0 }
  0x84   :  { %558 = vmatpush3.bf16.msra.mxu0 %v596_v33 }
  0x85   :  { %559 = vmatprep.subr.bf16.mxu0 %v726_v0 }
  0x88   :  { %560 = vmatpush3.bf16.msra.mxu0 %v597_v34 }
 0x13e   :  { %v188_v26 = vpop.f32.mrb[0].mxu0 }
 0x13f   :  { %v189_v27 = vadd.f32 %v451_v25, %v188_v26  ;;  %v523_v28 = vpop.f32.mrb[1].mxu0 }
 0x140   :  { %v191_v29 = vpop.f32.mrb[2].mxu0 }
 0x141   :  { %v194_v30 = vmax.f32 %v189_v27, 0.0  ;;  %v524_v31 = vpop.f32.mrb[3].mxu0 }
 0x143   :  { %v195_v32 = vpack.c.bf16 %v194_v30, %v194_v30 }
 0x145   :  { %542 = vmatmul.mubr.bf16.vlgmr.msra.gmra.mrb[0].mxu1 %v195_v32 }
 0x218   :  { %v301_v36 = vpop.f32.mrb[0].mxu1 }
 0x219   :  { %v302_v37 = vadd.f32 %v460_v35, %v301_v36  ;;  %v543_v38 = vpop.f32.mrb[1].mxu1 }
 0x21a   :  { %v304_v39 = vpop.f32.mrb[2].mxu1 }
 0x21b   :  { %v307_v40 = vmax.f32 %v302_v37, 0.0  ;;  %v544_v41 = vpop.f32.mrb[3].mxu1 }
 0x21d   :  { %v308_v42 = vpack.c.bf16 %v307_v40, %v307_v40 }
 0x21f   :  { %562 = vmatmul.mubr.bf16.vlgmr.msra.gmra.mrb[4].mxu0 %v308_v42 }
 0x2f2   :  { %v414_v46 = vpop.f32.mrb[4].mxu0 }
 0x2f3   :  { %v415_v47 = vadd.f32 %v469_v45, %v414_v46  ;;  %v563_v48 = vpop.f32.mrb[5].mxu0 }
 0x2f4   :  { %v417_v49 = vpop.f32.mrb[6].mxu0 }
 0x2f5   :  { %v564_v50 = vpop.f32.mrb[7].mxu0  ;;  %v423_v51 = vsel %vm422_vm1, %v415_v47, -1e+30 }
 0x2f6   :  { %424 = vmax.xlane.f32.xlu0 %v423_v51 }
 0x383   :  { %v425_v52 = vpop.xlane.xlu0 %424 }
 0x384   :  { %v426_v53 = vsub.f32 %v423_v51, %v425_v52 }
 0x386   :  { %v427_v54 = vmul.f32 1.442695, %v426_v53 }
 0x388   :  { %598 = vpow2.f32 %v427_v54 }
 0x392   :  { %v599_v55 = vpop.eup %598 }
 0x393   :  { %429 = vadd.xlane.f32.xlu0 %v599_v55 }
 0x420   :  { %v430_v56 = vpop.xlane.xlu0 %429 }
 0x421   :  { %600 = vrcp.f32 %v430_v56 }
 0x42b   :  { %v601_v57 = vpop.eup %600 }
 0x42c   :  { %v432_v58 = vmul.f32 %v601_v57, %v599_v55 }
 0x42e   :  { %433 = vst [vmem:[#allocation10] sm:$0xff] %v432_v58 }
 0x42f   :  { %701 = shalt.err (!%p698_p8)
}
 0x430   :  { %s702_s8 = scalar_lea.hbm %s884_s7, 128 }
 0x431   :  { %p703_p9 = scmp.ne.s32.totalorder %s884_s7, %s702_s8  ;;  %p706_p10 = scmp.lt.u32.totalorder %s702_s8, %s884_s7 }
 0x433   :  { %p708_p11 = pnand %p706_p10, %p703_p9 }
 0x435   :  { %711 = shalt.err (!%p708_p11)
}
 0x436   :  { %443 = dma.vmem_to_hbm [thread:$0]  %s441_s28, 128, %s884_s7, [#allocation4]  }
 0x437   :  { %718 = dma.done.wait [#allocation4], 128  }
 0x438   :  { %719 = vsyncadd [#allocation4], 4294967168 }
 0x439   :  { %447 = vsyncpa [#allocation3], 1 }
 0x43a   :  { %448 = vsyncpa [#allocation6], 1 }
 0x43b   :  { %449 = vsyncpa [#allocation9], 1 }
 0x43c   :  { %450 = vsyncpa [#allocation4], 1 }

</bundles_post_ra>
